<compile_context>
chip_gen: v5e
topology: v5e:2x2
jax: 0.10.0
libtpu: 0.0.40
codegen_flags: <defaults>
</compile_context>

<pallas_src>
from functools import partial

import jax
import jax.numpy as jnp
from jax.experimental import pallas as pl
from jax.experimental.pallas import tpu as pltpu

LANE = 128
TM_TARGET = 512    # aggregation row tile target
TK_TARGET = 1024   # aggregation contraction tile target


def _round_up(x, m):
    return (x + m - 1) // m * m


def _pad2(x, rows, cols):
    return jnp.pad(x, ((0, rows - x.shape[0]), (0, cols - x.shape[1])))


def _vmem_limit_bytes():
    """~75% of physical VMEM: ~96 MiB on v5e/v6e (128 MiB), ~48 MiB on v7x (64 MiB)."""
    cap = 128 * 1024 * 1024
    try:
        cap = int(pltpu.get_tpu_info().vmem_capacity_bytes)
    except Exception:
        pass
    return max(32 * 1024 * 1024, min(3 * cap // 4, 100 * 1024 * 1024))


def _pick_tile(n_pad, max_tile):
    """Largest power-of-2 multiple of 128 that divides n_pad, capped at max_tile."""
    t = max_tile
    while t > LANE and n_pad % t != 0:
        t //= 2
    return t


def _choose_agg_tiles(n):
    """Pick (tm, tk, n_pad) so big tiles always divide n_pad (pad N, don't shrink tiles)."""
    n128 = _round_up(n, LANE)
    if n128 <= TM_TARGET:
        return n128, n128, n128                 # single block in both dims
    n_pad = _round_up(n, TM_TARGET)             # waste < 512 zero rows/cols
    tk = TK_TARGET if n_pad % TK_TARGET == 0 else TM_TARGET
    return TM_TARGET, tk, n_pad


# ----------------------------- Pallas kernels --------------------------------

def xw_kernel(x_ref, w_ref, o_ref):
    # Feature transform: one row-tile of X times the full (small) W -> MXU.
    o_ref[...] = jnp.dot(
        x_ref[...], w_ref[...], preferred_element_type=jnp.float32
    ).astype(o_ref.dtype)


def feature_transform_pallas(x_bf, w_bf, *, vmem_limit, tm=512):
    """XW = X @ W, bf16 inputs, bf16 output, f32 MXU accumulation."""
    n_pad, f_in_pad = x_bf.shape
    f_out_pad = w_bf.shape[1]
    tm = _pick_tile(n_pad, min(tm, n_pad))
    cost = pl.CostEstimate(
        flops=2 * n_pad * f_in_pad * f_out_pad,
        transcendentals=0,
        bytes_accessed=2 * (n_pad * f_in_pad + f_in_pad * f_out_pad
                            + n_pad * f_out_pad),
    )
    return pl.pallas_call(
        xw_kernel,
        out_shape=jax.ShapeDtypeStruct((n_pad, f_out_pad), jnp.bfloat16),
        grid=(n_pad // tm,),
        in_specs=[
            pl.BlockSpec((tm, f_in_pad), lambda i: (i, 0)),          # X row tile
            pl.BlockSpec((f_in_pad, f_out_pad), lambda i: (0, 0)),   # full W
        ],
        out_specs=pl.BlockSpec((tm, f_out_pad), lambda i: (i, 0)),
        compiler_params=pltpu.CompilerParams(
            dimension_semantics=("parallel",),
            vmem_limit_bytes=vmem_limit,
        ),
        cost_estimate=cost,
    )(x_bf, w_bf)


def agg_kernel(flags_ref, colmap_ref, a_ref, xw_ref, b_ref, o_ref, acc_ref, *,
               apply_relu, xw_resident, tk):
    i = pl.program_id(0)
    k = pl.program_id(1)

    @pl.when(k == 0)
    def _():
        acc_ref[...] = jnp.zeros_like(acc_ref)

    # Block-sparse gating: skip MXU work on all-zero A_hat blocks.  Their
    # index_map also re-points at the previously fetched block, so no new DMA.
    @pl.when(flags_ref[i, k] != 0)
    def _():
        if xw_resident:
            start = pl.multiple_of(k * tk, tk)
            xw_blk = xw_ref[pl.ds(start, tk), :]
        else:
            xw_blk = xw_ref[...]
        acc_ref[...] += jnp.dot(
            a_ref[...], xw_blk, preferred_element_type=jnp.float32
        )

    @pl.when(k == pl.num_programs(1) - 1)
    def _():
        h = acc_ref[...] + b_ref[...]
        if apply_relu:
            h = jnp.maximum(h, 0.0)
        o_ref[...] = h.astype(o_ref.dtype)


def aggregate_pallas(a_bf, xw_bf, b, flags, colmap, *, apply_relu, out_dtype,
                     tm, tk, vmem_limit):
    """out = A_hat @ XW + b (+ ReLU), tiled over (row, contraction)."""
    n_pad = a_bf.shape[0]
    f_out_pad = xw_bf.shape[1]
    out_bytes = jnp.dtype(out_dtype).itemsize

    # Keep XW resident in VMEM (DMA'd exactly once) if it fits next to the
    # A_hat double-buffer; otherwise stream one (tk, F) tile per k step.
    resident_need = (2 * tm * tk * 2                    # A_hat tiles, 2 bufs
                     + 2 * n_pad * f_out_pad * 2        # resident XW (2 bufs worst case)
                     + 2 * tm * f_out_pad * out_bytes   # output tile, 2 bufs
                     + tm * f_out_pad * 4               # f32 accumulator
                     + (2 << 20))                       # headroom
    xw_resident = resident_need <= vmem_limit

    if xw_resident:
        xw_spec = pl.BlockSpec((n_pad, f_out_pad), lambda i, k, fl, cm: (0, 0))
        xw_traffic = 2 * n_pad * f_out_pad
    else:
        # Remapped through colmap too, so zero-block steps don't re-DMA XW.
        xw_spec = pl.BlockSpec((tk, f_out_pad),
                               lambda i, k, fl, cm: (cm[i, k], 0))
        xw_traffic = 2 * n_pad * f_out_pad * (n_pad // tm)

    kernel = partial(agg_kernel, apply_relu=apply_relu,
                     xw_resident=xw_resident, tk=tk)
    cost = pl.CostEstimate(
        flops=2 * n_pad * n_pad * f_out_pad,
        transcendentals=0,
        bytes_accessed=(2 * n_pad * n_pad            # A_hat bf16
                        + xw_traffic                 # XW bf16
                        + out_bytes * n_pad * f_out_pad
                        + 4 * f_out_pad),            # bias f32
    )

    return pl.pallas_call(
        kernel,
        out_shape=jax.ShapeDtypeStruct((n_pad, f_out_pad), out_dtype),
        grid_spec=pltpu.PrefetchScalarGridSpec(
            num_scalar_prefetch=2,                   # flags, colmap -> SMEM
            grid=(n_pad // tm, n_pad // tk),
            in_specs=[
                # A_hat tile; zero blocks map to the previously fetched block.
                pl.BlockSpec((tm, tk), lambda i, k, fl, cm: (i, cm[i, k])),
                xw_spec,
                pl.BlockSpec((1, f_out_pad), lambda i, k, fl, cm: (0, 0)),
            ],
            out_specs=pl.BlockSpec((tm, f_out_pad), lambda i, k, fl, cm: (i, 0)),
            scratch_shapes=[pltpu.VMEM((tm, f_out_pad), jnp.float32)],
        ),
        compiler_params=pltpu.CompilerParams(
            dimension_semantics=("parallel", "arbitrary"),
            vmem_limit_bytes=vmem_limit,
        ),
        cost_estimate=cost,
    )(flags, colmap, a_bf, xw_bf, b)


def gcn_conv(a_bf, x_bf, w_bf, b_pad, flags, colmap, *, apply_relu, out_dtype,
             tm, tk, vmem_limit):
    xw = feature_transform_pallas(x_bf, w_bf, vmem_limit=vmem_limit)
    return aggregate_pallas(a_bf, xw, b_pad, flags, colmap,
                            apply_relu=apply_relu, out_dtype=out_dtype,
                            tm=tm, tk=tk, vmem_limit=vmem_limit)


# ------------------------------- glue (JAX) ----------------------------------

def normalized_adjacency_bf16(edge_index, num_nodes, n_pad):
    """Dense bf16 D^-1/2 (A + I) D^-1/2, built directly at padded size.

    Graph preprocessing glue (data-dependent scatter) stays in plain JAX.
    Duplicate edges are summed, matching PyG's scatter-add behavior.
    """
    src = edge_index[0]
    dst = edge_index[1]
    loops = jnp.arange(num_nodes, dtype=edge_index.dtype)
    src = jnp.concatenate([src, loops])
    dst = jnp.concatenate([dst, loops])

    ones = jnp.ones(src.shape, jnp.float32)
    deg = jnp.zeros((num_nodes,), jnp.float32).at[dst].add(ones)
    deg_inv_sqrt = jnp.where(deg > 0, jax.lax.rsqrt(deg), 0.0)
    norm = deg_inv_sqrt[src] * deg_inv_sqrt[dst]

    # A_hat[i, j] = norm over edge j -> i so (A_hat @ XW)[i] aggregates nbrs of i.
    a_hat = jnp.zeros((n_pad, n_pad), jnp.float32).at[dst, src].add(norm)
    return a_hat.astype(jnp.bfloat16)


def block_sparsity_maps(a_pad_bf, tm, tk):
    """Per-(row-tile, col-tile) nonzero flags + DMA-dedup column-block map."""
    n_row = a_pad_bf.shape[0] // tm
    n_col = a_pad_bf.shape[1] // tk
    nz = (a_pad_bf != 0).reshape(n_row, tm, n_col, tk)
    flags = nz.any(axis=(1, 3)).astype(jnp.int32)                # (n_row, n_col)
    k_idx = jnp.broadcast_to(
        jnp.arange(n_col, dtype=jnp.int32)[None, :], flags.shape)
    marked = jnp.where(flags > 0, k_idx, -1)
    colmap = jnp.maximum(jax.lax.cummax(marked, axis=1), 0).astype(jnp.int32)
    return flags, colmap


def glorot_uniform(key, fan_in, fan_out):
    limit = jnp.sqrt(6.0 / (fan_in + fan_out))
    return jax.random.uniform(key, (fan_in, fan_out), jnp.float32, -limit, limit)


def init_gcn_params(key, in_channels, hidden, out_channels):
    k1, k2 = jax.random.split(key)
    return {
        "w1": glorot_uniform(k1, in_channels, hidden),
        "b1": jnp.zeros((1, hidden), jnp.float32),
        "w2": glorot_uniform(k2, hidden, out_channels),
        "b2": jnp.zeros((1, out_channels), jnp.float32),
    }


def gcn_forward(params, x, edge_index, *, out_channels):
    n, f_in = x.shape
    hidden = params["w1"].shape[1]

    tm, tk, n_pad = _choose_agg_tiles(n)
    f_in_pad = _round_up(f_in, LANE)
    hid_pad = _round_up(hidden, LANE)
    out_pad = _round_up(out_channels, LANE)
    vmem_limit = _vmem_limit_bytes()

    a_bf = normalized_adjacency_bf16(edge_index, n, n_pad)
    flags, colmap = block_sparsity_maps(a_bf, tm, tk)

    x_bf = _pad2(x, n_pad, f_in_pad).astype(jnp.bfloat16)
    w1_bf = _pad2(params["w1"], f_in_pad, hid_pad).astype(jnp.bfloat16)
    w2_bf = _pad2(params["w2"], hid_pad, out_pad).astype(jnp.bfloat16)
    b1_p = _pad2(params["b1"], 1, hid_pad)
    b2_p = _pad2(params["b2"], 1, out_pad)

    # Layer 1: hidden activations emitted directly as bf16 in-kernel (no extra
    # f32 HBM write + separate cast pass before layer 2's feature transform).
    h_bf = gcn_conv(a_bf, x_bf, w1_bf, b1_p, flags, colmap,
                    apply_relu=True, out_dtype=jnp.bfloat16,
                    tm=tm, tk=tk, vmem_limit=vmem_limit)
    out = gcn_conv(a_bf, h_bf, w2_bf, b2_p, flags, colmap,
                   apply_relu=False, out_dtype=jnp.float32,
                   tm=tm, tk=tk, vmem_limit=vmem_limit)
    return out[:n, :out_channels]


# --------------------------------- main ---------------------------------------

if __name__ == "__main__":
    key = jax.random.PRNGKey(0)
    k_x, k_e, k_p = jax.random.split(key, 3)

    num_nodes = 16
    in_channels = 4
    hidden = 64
    out_channels = 32
    num_edges = 40

    x = jax.random.normal(k_x, (num_nodes, in_channels), jnp.float32)
    edge_index = jax.random.randint(k_e, (2, num_edges), 0, num_nodes, jnp.int32)

    params = init_gcn_params(k_p, in_channels, hidden, out_channels)

    out = gcn_forward(params, x, edge_index, out_channels=out_channels)
    out = jax.block_until_ready(out)

    assert out.shape == (num_nodes, out_channels), out.shape
    assert out.dtype == jnp.float32

    # Pure-JAX reference mirroring the kernel's bf16 casts (f32 accumulation).
    def bf(v):
        return v.astype(jnp.bfloat16).astype(jnp.float32)

    a_ref = normalized_adjacency_bf16(edge_index, num_nodes, num_nodes)
    a_ref = a_ref.astype(jnp.float32)
    xw1_ref = bf(jnp.dot(bf(x), bf(params["w1"])))
    h_ref = bf(jnp.maximum(jnp.dot(a_ref, xw1_ref) + params["b1"], 0.0))
    xw2_ref = bf(jnp.dot(h_ref, bf(params["w2"])))
    out_ref = jnp.dot(a_ref, xw2_ref) + params["b2"]

    err = jnp.max(jnp.abs(out - out_ref))
    assert jnp.allclose(out, out_ref, atol=1e-2, rtol=1e-2), err

    print("KERNEL_OK")
</pallas_src>

<mosaic_0001>
module attributes {stable_mosaic.version = 11 : i64} {
  func.func @xw_kernel(%arg0: i32, %arg1: memref<128x128xbf16, #tpu.memory_space<vmem>>, %arg2: memref<128x128xbf16, #tpu.memory_space<vmem>>, %arg3: memref<128x128xbf16, #tpu.memory_space<vmem>>) attributes {dimension_semantics = [#tpu.dimension_semantics<parallel>], iteration_bounds = array<i64: 1>, scalar_prefetch = 0 : i64, scratch_operands = 0 : i64, tpu.core_type = #tpu.core_type<tc>, window_params = [{transform_indices = @transform_0, window_bounds = array<i64: 128, 128>}, {pipeline_mode = #tpu.pipeline_mode<synchronous>, transform_indices = @transform_1, window_bounds = array<i64: 128, 128>}, {transform_indices = @transform_2, window_bounds = array<i64: 128, 128>}]} {
    %c0 = arith.constant 0 : index
    %c0_0 = arith.constant 0 : index
    %0 = vector.load %arg1[%c0, %c0_0] : memref<128x128xbf16, #tpu.memory_space<vmem>>, vector<128x128xbf16>
    %c0_1 = arith.constant 0 : index
    %c0_2 = arith.constant 0 : index
    %1 = vector.load %arg2[%c0_1, %c0_2] : memref<128x128xbf16, #tpu.memory_space<vmem>>, vector<128x128xbf16>
    %cst = arith.constant dense<0.000000e+00> : vector<128x128xf32>
    %2 = tpu.matmul %0, %1, %cst {dimension_numbers = #tpu.dot_dimension_numbers<[1], [0], [0], [1], [0, 0, 1, 1], [], []>} : vector<128x128xbf16>, vector<128x128xbf16>, vector<128x128xf32> -> vector<128x128xf32>
    %3 = arith.truncf %2 : vector<128x128xf32> to vector<128x128xbf16>
    %c0_3 = arith.constant 0 : index
    %c0_4 = arith.constant 0 : index
    %4 = vector.load %arg3[%c0_3, %c0_4] : memref<128x128xbf16, #tpu.memory_space<vmem>>, vector<128x128xbf16>
    tpu.vector_store %arg3[%c0_3, %c0_4], %3 {strides = array<i32>} : memref<128x128xbf16, #tpu.memory_space<vmem>>, vector<128x128xbf16>,
    return
  }
  func.func @transform_0(%arg0: i32) -> (i32, i32) {
    %c0_i32 = arith.constant 0 : i32
    %c0_i32_0 = arith.constant 0 : i32
    return %arg0, %c0_i32 : i32, i32
  }
  func.func @transform_1(%arg0: i32) -> (i32, i32) {
    %c0_i32 = arith.constant 0 : i32
    %c0_i32_0 = arith.constant 0 : i32
    %c0_i32_1 = arith.constant 0 : i32
    return %c0_i32, %c0_i32_0 : i32, i32
  }
  func.func @transform_2(%arg0: i32) -> (i32, i32) {
    %c0_i32 = arith.constant 0 : i32
    %c0_i32_0 = arith.constant 0 : i32
    return %arg0, %c0_i32 : i32, i32
  }
}

</mosaic_0001>

<bundles_post_ra>
// kernel: tpu_custom_call.1
= control target key start
LH: loop header
LB: loop body
LE: loop exit
PB: predicated region body
PF: predicated region fallthrough
CT: control target
= control target key end

     0   :  { %7 = vsyncpa [#allocation3], 0  ;;  %s545_s0 = inlined_call_operand.hbm [shape: bf16[128,128], index: 0, kind: input, shape index: {}]   ;;  %s546_s1 = inlined_call_operand.hbm [shape: bf16[128,128], index: 1, kind: input, shape index: {}]   ;;  %s547_s2 = inlined_call_operand.hbm [shape: bf16[128,128], index: 2, kind: output, shape index: {}]  }
   0x1   :  { %8 = vsyncpa [#allocation6], 0 }
   0x2   :  { %9 = vsyncpa [#allocation4], 0  ;;  %s14_s11 = sshll.u32 %s545_s0, 4  ;;  %s507_s12 = smov [#allocation2]   ;;  %s15_s11 = int_to_ptr.hbm [resolvable:$true] %s14_s11 }
   0x3   :  { %s16_s13 = sshll.u32 %s507_s12, 4  ;;  %s27_s16 = sshll.u32 %s546_s1, 4  ;;  %s17_s13 = int_to_ptr.vmem [resolvable:$true] %s16_s13  ;;  %s28_s16 = int_to_ptr.hbm [resolvable:$true] %s27_s16 }
   0x4   :  { %s508_s17 = smov 64   ;;  %s509_s18 = smov 4  }
   0x5   :  { %22 = dma.hbm_to_vmem [thread:$0]  %s15_s11, 1024, %s17_s13, [#allocation3], %s508_s17, %s508_s17, %s509_s18  }
   0x6   :  { %s510_s19 = smov [#allocation5]  }
   0x7   :  { %s29_s20 = sshll.u32 %s510_s19, 4  ;;  %s30_s20 = int_to_ptr.vmem [resolvable:$true] %s29_s20 }
   0x8   :  { %35 = dma.hbm_to_vmem [thread:$0]  %s28_s16, 1024, %s30_s20, [#allocation6], %s508_s17, %s508_s17, %s509_s18  }
   0x9   :  { %501 = dma.done.wait [#allocation3], 1024  }
   0xa   :  { %502 = vsyncadd [#allocation3], 4294966272 }
   0xb   :  { %503 = dma.done.wait [#allocation6], 1024  }
   0xc   :  { %504 = vsyncadd [#allocation6], 4294966272  ;;  %v352_v0 = vld [vmem:[#allocation5 + $0x38] sm:$0xff]  ;;  %v351_v1 = vld [vmem:[#allocation5 + $0x30] sm:$0xff]  ;;  %s511_s0 = smov [#allocation7]   ;;  %s259_s23 = sshll.u32 %s547_s2, 4  ;;  %s260_s23 = int_to_ptr.hbm [resolvable:$true] %s259_s23 }
   0xd   :  { %172 = vmatpush.bf16.msra.mxu0 %v352_v0  ;;  %400 = vmatpush.bf16.msra.mxu1 %v352_v0  ;;  %v350_v2 = vld [vmem:[#allocation5 + $0x28] sm:$0xff]  ;;  %v349_v3 = vld [vmem:[#allocation5 + $0x20] sm:$0xff]  ;;  %v348_v4 = vld [vmem:[#allocation5 + $0x18] sm:$0xff]  ;;  %s257_s1 = sshll.u32 %s511_s0, 4  ;;  %s258_s1 = int_to_ptr.vmem [resolvable:$true] %s257_s1 }
   0xe   :  { %401 = vmatpush.bf16.msra.mxu2 %v352_v0  ;;  %402 = vmatpush.bf16.msra.mxu3 %v352_v0  ;;  %v347_v5 = vld [vmem:[#allocation5 + $0x10] sm:$0xff]  ;;  %v346_v6 = vld [vmem:[#allocation5 + $0x8] sm:$0xff]  ;;  %v345_v7 = vld [vmem:[#allocation5] sm:$0xff] }
   0xf   :  { %v337_v8 = vld [vmem:[#allocation2] sm:$0xff]  ;;  %v339_v9 = vld [vmem:[#allocation2 + $0x10] sm:$0xff]  ;;  %v338_v12 = vld [vmem:[#allocation2 + $0x8] sm:$0xff] }
  0x10   :  { %v341_v10 = vld [vmem:[#allocation2 + $0x20] sm:$0xff]  ;;  %v343_v11 = vld [vmem:[#allocation2 + $0x30] sm:$0xff]  ;;  %v340_v13 = vld [vmem:[#allocation2 + $0x18] sm:$0xff] }
  0x11   :  { %173 = vmatpush.bf16.msra.mxu0 %v351_v1  ;;  %403 = vmatpush.bf16.msra.mxu1 %v351_v1  ;;  %v342_v14 = vld [vmem:[#allocation2 + $0x28] sm:$0xff]  ;;  %v344_v15 = vld [vmem:[#allocation2 + $0x38] sm:$0xff] }
  0x12   :  { %404 = vmatpush.bf16.msra.mxu2 %v351_v1  ;;  %405 = vmatpush.bf16.msra.mxu3 %v351_v1 }
  0x15   :  { %174 = vmatpush.bf16.msra.mxu0 %v350_v2  ;;  %406 = vmatpush.bf16.msra.mxu1 %v350_v2 }
  0x16   :  { %407 = vmatpush.bf16.msra.mxu2 %v350_v2  ;;  %408 = vmatpush.bf16.msra.mxu3 %v350_v2 }
  0x19   :  { %175 = vmatpush.bf16.msra.mxu0 %v349_v3  ;;  %409 = vmatpush.bf16.msra.mxu1 %v349_v3 }
  0x1a   :  { %410 = vmatpush.bf16.msra.mxu2 %v349_v3  ;;  %411 = vmatpush.bf16.msra.mxu3 %v349_v3 }
  0x1d   :  { %176 = vmatpush.bf16.msra.mxu0 %v348_v4  ;;  %412 = vmatpush.bf16.msra.mxu1 %v348_v4 }
  0x1e   :  { %413 = vmatpush.bf16.msra.mxu2 %v348_v4  ;;  %414 = vmatpush.bf16.msra.mxu3 %v348_v4 }
  0x21   :  { %177 = vmatpush.bf16.msra.mxu0 %v347_v5  ;;  %415 = vmatpush.bf16.msra.mxu1 %v347_v5 }
  0x22   :  { %416 = vmatpush.bf16.msra.mxu2 %v347_v5  ;;  %417 = vmatpush.bf16.msra.mxu3 %v347_v5 }
  0x25   :  { %178 = vmatpush.bf16.msra.mxu0 %v346_v6  ;;  %418 = vmatpush.bf16.msra.mxu1 %v346_v6 }
  0x26   :  { %419 = vmatpush.bf16.msra.mxu2 %v346_v6  ;;  %420 = vmatpush.bf16.msra.mxu3 %v346_v6 }
  0x29   :  { %179 = vmatpush.bf16.msra.mxu0 %v345_v7  ;;  %421 = vmatpush.bf16.msra.mxu1 %v345_v7 }
  0x2a   :  { %422 = vmatpush.bf16.msra.mxu2 %v345_v7  ;;  %423 = vmatpush.bf16.msra.mxu3 %v345_v7 }
  0x2c   :  { %180 = vmatmul.bf16.vlgmr.msra.gmra.mxu0 %v337_v8  ;;  %190 = vmatmul.bf16.vlgmr.msra.gmra.mxu1 %v339_v9 }
  0x2d   :  { %200 = vmatmul.bf16.vlgmr.msra.gmra.mxu2 %v341_v10  ;;  %210 = vmatmul.bf16.vlgmr.msra.gmra.mxu3 %v343_v11 }
  0x3c   :  { %185 = vmatmul.bf16.gmra.mxu0 %v338_v12  ;;  %195 = vmatmul.bf16.gmra.mxu1 %v340_v13 }
  0x3d   :  { %205 = vmatmul.bf16.gmra.mxu2 %v342_v14  ;;  %215 = vmatmul.bf16.gmra.mxu3 %v344_v15 }
  0xa9   :  { %v181_v16 = vpop.f32.mrf.mxu0  ;;  %v191_v17 = vpop.f32.mrf.mxu1 }
  0xb0   :  { %v201_v18 = vpop.f32.mrf.mxu2  ;;  %v211_v19 = vpop.f32.mrf.mxu3 }
  0xb1   :  { %v183_v20 = vpop.f32.mrf.mxu0  ;;  %v193_v21 = vpop.f32.mrf.mxu1 }
  0xb2   :  { %v356_v22 = vpack.c.bf16 %v183_v20, %v181_v16  ;;  %v366_v23 = vpack.c.bf16 %v193_v21, %v191_v17 }
  0xb4   :  { %357 = vst [vmem:[#allocation7] sm:$0xff] %v356_v22  }
  0xb5   :  { %394 = vst [vmem:[#allocation7 + $0x10] sm:$0xff] %v366_v23  }
  0xb8   :  { %v203_v24 = vpop.f32.mrf.mxu2  ;;  %v213_v25 = vpop.f32.mrf.mxu3 }
  0xb9   :  { %v376_v26 = vpack.c.bf16 %v203_v24, %v201_v18  ;;  %v386_v27 = vpack.c.bf16 %v213_v25, %v211_v19  ;;  %v186_v28 = vpop.f32.mrf.mxu0  ;;  %v196_v29 = vpop.f32.mrf.mxu1 }
  0xbb   :  { %396 = vst [vmem:[#allocation7 + $0x20] sm:$0xff] %v376_v26  }
  0xbc   :  { %398 = vst [vmem:[#allocation7 + $0x30] sm:$0xff] %v386_v27  }
  0xc0   :  { %v206_v30 = vpop.f32.mrf.mxu2  ;;  %v216_v31 = vpop.f32.mrf.mxu3 }
  0xc1   :  { %v188_v32 = vpop.f32.mrf.mxu0  ;;  %v198_v33 = vpop.f32.mrf.mxu1 }
  0xc2   :  { %v361_v34 = vpack.c.bf16 %v188_v32, %v186_v28  ;;  %v371_v35 = vpack.c.bf16 %v198_v33, %v196_v29 }
  0xc4   :  { %393 = vst [vmem:[#allocation7 + $0x8] sm:$0xff] %v361_v34  }
  0xc5   :  { %395 = vst [vmem:[#allocation7 + $0x18] sm:$0xff] %v371_v35  }
  0xc8   :  { %v208_v36 = vpop.f32.mrf.mxu2  ;;  %v218_v37 = vpop.f32.mrf.mxu3 }
  0xc9   :  { %v381_v38 = vpack.c.bf16 %v208_v36, %v206_v30  ;;  %v391_v39 = vpack.c.bf16 %v218_v37, %v216_v31 }
  0xcb   :  { %397 = vst [vmem:[#allocation7 + $0x28] sm:$0xff] %v381_v38  }
  0xcc   :  { %399 = vst [vmem:[#allocation7 + $0x38] sm:$0xff] %v391_v39  }
  0xcd   :  { %265 = dma.vmem_to_hbm [thread:$0]  %s258_s1, 1024, %s260_s23, [#allocation4], %s508_s17, %s508_s17, %s509_s18  }
  0xce   :  { %505 = dma.done.wait [#allocation4], 1024  }
  0xcf   :  { %506 = vsyncadd [#allocation4], 4294966272 }
  0xd0   :  { %270 = vsyncpa [#allocation3], 1 }
  0xd1   :  { %271 = vsyncpa [#allocation6], 1 }
  0xd2   :  { %272 = vsyncpa [#allocation4], 1 }

</bundles_post_ra>
